<compile_context>
chip_gen: v7x
topology: tpu7x:2x2x1
jax: 0.10.0
libtpu: 0.0.40
codegen_flags: <defaults>
</compile_context>

<pallas_src>
import functools

import jax
import jax.numpy as jnp
from jax.experimental import pallas as pl
from jax.experimental.pallas import tpu as pltpu

BN_EPS = 1e-5


def _round_up(v, m):
    return ((v + m - 1) // m) * m


def _snap_tile(t, dim128):
    t = _round_up(max(int(t), 128), 128)
    return min(t, dim128)


def _vmem_capacity_bytes():
    """Per-TensorCore VMEM capacity; conservative fallback if the query fails."""
    try:
        cap = int(pltpu.get_tpu_info().vmem_capacity_bytes)
        if cap > 0:
            return cap
    except Exception:
        pass
    return 64 << 20  # v7x per-TC VMEM (smallest of v5e/v6e/v7x) -> safe everywhere


def _plan_tiles(n, cin, cout, x_itemsize, w_itemsize, out_itemsize, budget):
    """N- and VMEM-budget-aware tile selection."""
    cin128 = _round_up(cin, 128)
    cout128 = _round_up(cout, 128)

    # x residency: keep the whole (N, Cin) activation in VMEM (fetched once) when it
    # is a modest fraction of the budget.  Counted x2 in case the pipeliner keeps two
    # buffers for it.
    x_resident = 2 * n * cin128 * x_itemsize <= budget // 2

    # Cout tile: the f32 accumulator + double-buffered output scale with N and must
    # fit in roughly half the budget.
    per_col = n * (4 + 2 * out_itemsize)
    tn = (budget // 2) // max(per_col, 1)
    tn = max(128, (tn // 128) * 128)
    if n <= 256:
        soft = 2048        # small N: weight-streaming bound, grow output tiles
    elif n <= 2048:
        soft = 512
    else:
        soft = 256         # large N (incl. v7x 64 MiB): keep acc/out tiles modest
    tn = min(tn, soft, cout128)
    # Megacore (v7x has 2 TensorCores): keep >= 2 Cout tiles to shard across.
    if cout128 > 128 and tn >= cout128:
        tn = max(128, _round_up(cout128 // 2, 128))

    # Cin tile: leftover budget goes to the streamed weight tile (and the streamed x
    # tile when x is not resident).
    used = n * tn * (4 + 2 * out_itemsize)
    used += 2 * n * cin128 * x_itemsize if x_resident else 0
    left = max(budget - used, 2 * 128 * 128 * w_itemsize)
    per_k = 2 * tn * w_itemsize + (0 if x_resident else 2 * n * x_itemsize)
    tk = left // max(per_k, 1)
    tk = max(128, (tk // 128) * 128)
    tk = min(tk, cin128)
    return x_resident, tn, tk


def _fc_block_kernel(x_ref, w_ref, gamma_ref, beta_ref, o_ref, acc_ref,
                     *, x_resident, tk, inv_n):
    # x: (N, Cin_pad) resident OR (N, tk) streamed; w: (tk, tn); gamma/beta: (1, tn)
    # o: (N, tn); acc: (N, tn) f32
    k = pl.program_id(1)

    @pl.when(k == 0)
    def _():
        acc_ref[...] = jnp.zeros_like(acc_ref)

    if x_resident:
        start = pl.multiple_of(k * tk, 128)
        x = x_ref[:, pl.ds(start, tk)]
    else:
        x = x_ref[...]

    # Partial Linear: (N, tk) @ (tk, tn) on the MXU, f32 accumulation.
    acc_ref[...] += jnp.dot(x, w_ref[...], preferred_element_type=jnp.float32)

    @pl.when(k == pl.num_programs(1) - 1)
    def _():
        y = acc_ref[...]
        # Training-mode BatchNorm1d batch statistics (biased variance), centered
        # form in f32 (numerically safe; no E[x^2]-mean^2 cancellation).
        mean = jnp.sum(y, axis=0, keepdims=True) * inv_n
        centered = y - mean
        var = jnp.sum(centered * centered, axis=0, keepdims=True) * inv_n
        # Fold gamma into the normalization scale: single FMA sweep over (N, tn).
        scale = gamma_ref[...] * jax.lax.rsqrt(var + BN_EPS)   # rsqrt on the EUP
        z = centered * scale + beta_ref[...]
        # SiLU: z * sigmoid(z)  (sigmoid on the EUP)
        o_ref[...] = (z * jax.nn.sigmoid(z)).astype(o_ref.dtype)


def fc_block(x, weight, bias, gamma, beta, *, mxu_dtype=None,
             tn=None, tk=None, x_resident=None):
    """Fused Linear -> BatchNorm1d(train) -> SiLU.

    x: (N, Cin); weight: (Cout, Cin); bias/gamma/beta: (Cout,).
    `bias` is accepted for API parity with nn.Linear but is mathematically cancelled
    by the training-mode batch-mean subtraction, so it is never read.
    `mxu_dtype` (e.g. jnp.bfloat16) optionally casts the MXU inputs; accumulation and
    the BN/SiLU epilogue stay in f32.
    """
    del bias  # exactly cancelled by training-mode BN mean subtraction
    n, cin = x.shape
    cout, cin_w = weight.shape
    assert cin_w == cin, "weight must be (Cout, Cin)"
    out_dtype = x.dtype
    out_itemsize = jnp.dtype(out_dtype).itemsize

    x_dt = jnp.dtype(mxu_dtype) if mxu_dtype is not None else jnp.dtype(x.dtype)
    w_dt = jnp.dtype(mxu_dtype) if mxu_dtype is not None else jnp.dtype(weight.dtype)

    cap = _vmem_capacity_bytes()
    budget = (cap * 3) // 4                      # headroom for compiler scratch
    auto_res, auto_tn, auto_tk = _plan_tiles(
        n, cin, cout, x_dt.itemsize, w_dt.itemsize, out_itemsize, budget)

    cin128 = _round_up(cin, 128)
    cout128 = _round_up(cout, 128)
    tn = auto_tn if tn is None else _snap_tile(tn, cout128)
    tk = auto_tk if tk is None else _snap_tile(tk, cin128)
    if x_resident is None:
        x_resident = auto_res

    cout_pad = _round_up(cout, tn)               # multiple of tn (and of 128)
    cin_pad = _round_up(cin, tk)
    grid = (cout_pad // tn, cin_pad // tk)

    # Layout plumbing: present the weight as (Cin, Cout) so the MXU contracts K on
    # sublanes with no per-tile XLU transpose.  One-time cost, amortized over calls
    # (store the weight in this layout upstream in production).
    w_t = weight.T
    if mxu_dtype is not None:
        x = x.astype(mxu_dtype)
        w_t = w_t.astype(mxu_dtype)
    if cin_pad != cin:
        x = jnp.pad(x, ((0, 0), (0, cin_pad - cin)))
    if cin_pad != cin or cout_pad != cout:
        w_t = jnp.pad(w_t, ((0, cin_pad - cin), (0, cout_pad - cout)))
    g2 = gamma.astype(jnp.float32).reshape(1, cout)
    b2 = beta.astype(jnp.float32).reshape(1, cout)
    if cout_pad != cout:
        g2 = jnp.pad(g2, ((0, 0), (0, cout_pad - cout)))
        b2 = jnp.pad(b2, ((0, 0), (0, cout_pad - cout)))

    if x_resident:
        # Constant block index -> DMA'd from HBM once, stays resident in VMEM.
        x_spec = pl.BlockSpec((n, cin_pad), lambda j, k: (0, 0))
    else:
        x_spec = pl.BlockSpec((n, tk), lambda j, k: (0, k))

    # Explicit scoped-VMEM limit from the real footprint (defaults are 16/32 MiB).
    footprint = n * tn * 4                                    # f32 accumulator
    footprint += 2 * n * tn * out_itemsize                    # double-buffered out
    footprint += 2 * tk * tn * w_dt.itemsize                  # double-buffered weight
    footprint += (2 * n * cin_pad * x_dt.itemsize) if x_resident \
        else (2 * n * tk * x_dt.itemsize)                     # x (resident or streamed)
    vmem_limit = int(min(cap * 9 // 10, max(footprint + (4 << 20), 32 << 20)))

    x_hbm_reads = 1 if x_resident else grid[0]
    cost = pl.CostEstimate(
        flops=2 * n * cin_pad * cout_pad,
        transcendentals=n * cout_pad + cout_pad,              # sigmoid + rsqrt
        bytes_accessed=(x_hbm_reads * n * cin_pad * x_dt.itemsize
                        + cin_pad * cout_pad * w_dt.itemsize
                        + 2 * cout_pad * 4
                        + n * cout_pad * out_itemsize),
    )

    kernel = functools.partial(_fc_block_kernel,
                               x_resident=bool(x_resident), tk=tk, inv_n=1.0 / n)

    out = pl.pallas_call(
        kernel,
        out_shape=jax.ShapeDtypeStruct((n, cout_pad), out_dtype),
        grid_spec=pltpu.PrefetchScalarGridSpec(
            num_scalar_prefetch=0,
            grid=grid,
            in_specs=[
                x_spec,
                pl.BlockSpec((tk, tn), lambda j, k: (k, j)),   # weight as (Cin, Cout)
                pl.BlockSpec((1, tn), lambda j, k: (0, j)),    # gamma
                pl.BlockSpec((1, tn), lambda j, k: (0, j)),    # beta
            ],
            out_specs=pl.BlockSpec((n, tn), lambda j, k: (0, j)),
            scratch_shapes=[pltpu.VMEM((n, tn), jnp.float32)],
        ),
        compiler_params=pltpu.CompilerParams(
            dimension_semantics=("parallel", "arbitrary"),
            vmem_limit_bytes=vmem_limit,
        ),
        cost_estimate=cost,
    )(x, w_t, g2, b2)

    if cout_pad != cout:
        out = out[:, :cout]
    return out


def fc_block_ref(x, weight, bias, gamma, beta):
    y = x @ weight.T + bias
    mean = jnp.mean(y, axis=0, keepdims=True)
    var = jnp.mean((y - mean) ** 2, axis=0, keepdims=True)
    xhat = (y - mean) / jnp.sqrt(var + BN_EPS)
    z = gamma * xhat + beta
    return z * jax.nn.sigmoid(z)


def _make_params(key, n, cin, cout):
    k_x, k_w, k_b, k_g, k_be = jax.random.split(key, 5)
    x = jax.random.normal(k_x, (n, cin), dtype=jnp.float32)
    bound = 1.0 / (cin ** 0.5)
    weight = jax.random.uniform(k_w, (cout, cin), minval=-bound, maxval=bound,
                                dtype=jnp.float32)
    bias = jax.random.uniform(k_b, (cout,), minval=-bound, maxval=bound,
                              dtype=jnp.float32)
    gamma = 1.0 + 0.1 * jax.random.normal(k_g, (cout,), dtype=jnp.float32)
    beta = 0.1 * jax.random.normal(k_be, (cout,), dtype=jnp.float32)
    return x, weight, bias, gamma, beta


if __name__ == "__main__":
    key = jax.random.PRNGKey(0)
    k1, k2 = jax.random.split(key)

    # 1) Small ragged shapes: exercises Cin/Cout zero-padding, resident x,
    #    auto tile plan, output slice-back.
    N, CIN, COUT = 8, 40, 200
    x, w, b, g, be = _make_params(k1, N, CIN, COUT)
    out = jax.block_until_ready(fc_block(x, w, b, g, be))
    ref = fc_block_ref(x, w, b, g, be)
    assert out.shape == (N, COUT)
    assert jnp.max(jnp.abs(out - ref)) < 3e-4

    # 2) Multi-tile grid (2, 2): resident x sliced with pl.ds along the Cin reduction.
    N2, CIN2, COUT2 = 8, 256, 256
    x2, w2, b2, g2, be2 = _make_params(k2, N2, CIN2, COUT2)
    out2 = jax.block_until_ready(fc_block(x2, w2, b2, g2, be2, tn=128, tk=128))
    ref2 = fc_block_ref(x2, w2, b2, g2, be2)
    assert out2.shape == (N2, COUT2)
    assert jnp.max(jnp.abs(out2 - ref2)) < 3e-4

    # 3) Same shapes, streamed-x path (index_map varies with k).
    out3 = jax.block_until_ready(
        fc_block(x2, w2, b2, g2, be2, tn=128, tk=128, x_resident=False))
    assert jnp.max(jnp.abs(out3 - ref2)) < 3e-4

    # 4) bf16 MXU-feed path (f32 accumulation + f32 epilogue), loose tolerance.
    out4 = jax.block_until_ready(
        fc_block(x2, w2, b2, g2, be2, mxu_dtype=jnp.bfloat16))
    assert jnp.max(jnp.abs(out4 - ref2)) < 1e-1

    print("KERNEL_OK")
</pallas_src>

<mosaic_0001>
module attributes {stable_mosaic.version = 11 : i64} {
  func.func @_fc_block_kernel(%arg0: i32, %arg1: i32, %arg2: memref<8x128xf32, #tpu.memory_space<vmem>>, %arg3: memref<128x128xf32, #tpu.memory_space<vmem>>, %arg4: memref<1x128xf32, #tpu.memory_space<vmem>>, %arg5: memref<1x128xf32, #tpu.memory_space<vmem>>, %arg6: memref<8x128xf32, #tpu.memory_space<vmem>>, %arg7: memref<8x128xf32, #tpu.memory_space<vmem>>) attributes {dimension_semantics = [#tpu.dimension_semantics<parallel>, #tpu.dimension_semantics<arbitrary>], iteration_bounds = array<i64: 2, 1>, scalar_prefetch = 0 : i64, scratch_operands = 1 : i64, tpu.core_type = #tpu.core_type<tc>, window_params = [{pipeline_mode = #tpu.pipeline_mode<synchronous>, transform_indices = @transform_0, window_bounds = array<i64: 8, 128>}, {transform_indices = @transform_1, window_bounds = array<i64: 128, 128>}, {transform_indices = @transform_2, window_bounds = array<i64: 1, 128>}, {transform_indices = @transform_3, window_bounds = array<i64: 1, 128>}, {transform_indices = @transform_4, window_bounds = array<i64: 8, 128>}]} {
    %c0_i32 = arith.constant 0 : i32
    %0 = arith.cmpi eq, %arg1, %c0_i32 : i32
    %1 = arith.extui %0 : i1 to i32
    %c0_i32_0 = arith.constant 0 : i32
    %2 = arith.cmpi ne, %1, %c0_i32_0 : i32
    scf.if %2 {
      %cst_9 = arith.constant 0.000000e+00 : f32
      %15 = vector.broadcast %cst_9 : f32 to vector<8x128xf32>
      %c0_10 = arith.constant 0 : index
      %c0_11 = arith.constant 0 : index
      %16 = vector.load %arg7[%c0_10, %c0_11] : memref<8x128xf32, #tpu.memory_space<vmem>>, vector<8x128xf32>
      tpu.vector_store %arg7[%c0_10, %c0_11], %15 {strides = array<i32>} : memref<8x128xf32, #tpu.memory_space<vmem>>, vector<8x128xf32>,
    } else {
    }
    %c128_i32 = arith.constant 128 : i32
    %3 = arith.muli %arg1, %c128_i32 : i32
    %4 = tpu.assume_multiple %3, 128 : i32
    %c0 = arith.constant 0 : index
    %5 = arith.index_cast %4 : i32 to index
    %6 = vector.load %arg2[%c0, %5] : memref<8x128xf32, #tpu.memory_space<vmem>>, vector<8x128xf32>
    %c0_1 = arith.constant 0 : index
    %c0_2 = arith.constant 0 : index
    %7 = vector.load %arg7[%c0_1, %c0_2] : memref<8x128xf32, #tpu.memory_space<vmem>>, vector<8x128xf32>
    %c0_3 = arith.constant 0 : index
    %c0_4 = arith.constant 0 : index
    %8 = vector.load %arg3[%c0_3, %c0_4] : memref<128x128xf32, #tpu.memory_space<vmem>>, vector<128x128xf32>
    %cst = arith.constant dense<0.000000e+00> : vector<8x128xf32>
    %9 = tpu.matmul %6, %8, %cst {dimension_numbers = #tpu.dot_dimension_numbers<[1], [0], [0], [1], [0, 0, 1, 1], [], []>} : vector<8x128xf32>, vector<128x128xf32>, vector<8x128xf32> -> vector<8x128xf32>
    %10 = arith.addf %7, %9 : vector<8x128xf32>
    %c0_5 = arith.constant 0 : index
    %c0_6 = arith.constant 0 : index
    %11 = vector.load %arg7[%c0_5, %c0_6] : memref<8x128xf32, #tpu.memory_space<vmem>>, vector<8x128xf32>
    tpu.vector_store %arg7[%c0_5, %c0_6], %10 {strides = array<i32>} : memref<8x128xf32, #tpu.memory_space<vmem>>, vector<8x128xf32>,
    %c0_i32_7 = arith.constant 0 : i32
    %12 = arith.cmpi eq, %arg1, %c0_i32_7 : i32
    %13 = arith.extui %12 : i1 to i32
    %c0_i32_8 = arith.constant 0 : i32
    %14 = arith.cmpi ne, %13, %c0_i32_8 : i32
    scf.if %14 {
      %c0_9 = arith.constant 0 : index
      %c0_10 = arith.constant 0 : index
      %15 = vector.load %arg7[%c0_9, %c0_10] : memref<8x128xf32, #tpu.memory_space<vmem>>, vector<8x128xf32>
      %cst_11 = arith.constant dense<0.000000e+00> : vector<128xf32>
      %16 = vector.multi_reduction <add>, %15, %cst_11 [0] : vector<8x128xf32> to vector<128xf32>
      %17 = vector.shape_cast %16 : vector<128xf32> to vector<1x128xf32>
      %cst_12 = arith.constant 1.250000e-01 : f32
      %18 = vector.broadcast %cst_12 : f32 to vector<1x128xf32>
      %19 = arith.mulf %17, %18 : vector<1x128xf32>
      %20 = vector.broadcast %19 : vector<1x128xf32> to vector<8x128xf32>
      %21 = arith.subf %15, %20 : vector<8x128xf32>
      %22 = arith.mulf %21, %21 : vector<8x128xf32>
      %cst_13 = arith.constant dense<0.000000e+00> : vector<128xf32>
      %23 = vector.multi_reduction <add>, %22, %cst_13 [0] : vector<8x128xf32> to vector<128xf32>
      %24 = vector.shape_cast %23 : vector<128xf32> to vector<1x128xf32>
      %cst_14 = arith.constant 1.250000e-01 : f32
      %25 = vector.broadcast %cst_14 : f32 to vector<1x128xf32>
      %26 = arith.mulf %24, %25 : vector<1x128xf32>
      %c0_15 = arith.constant 0 : index
      %c0_16 = arith.constant 0 : index
      %27 = vector.load %arg4[%c0_15, %c0_16] : memref<1x128xf32, #tpu.memory_space<vmem>>, vector<1x128xf32>
      %cst_17 = arith.constant 9.99999974E-6 : f32
      %28 = vector.broadcast %cst_17 : f32 to vector<1x128xf32>
      %29 = arith.addf %26, %28 : vector<1x128xf32>
      %30 = math.rsqrt %29 : vector<1x128xf32>
      %31 = arith.mulf %27, %30 : vector<1x128xf32>
      %32 = vector.broadcast %31 : vector<1x128xf32> to vector<8x128xf32>
      %33 = arith.mulf %21, %32 : vector<8x128xf32>
      %c0_18 = arith.constant 0 : index
      %c0_19 = arith.constant 0 : index
      %34 = vector.load %arg5[%c0_18, %c0_19] : memref<1x128xf32, #tpu.memory_space<vmem>>, vector<1x128xf32>
      %35 = vector.broadcast %34 : vector<1x128xf32> to vector<8x128xf32>
      %36 = arith.addf %33, %35 : vector<8x128xf32>
      %37 = arith.negf %36 : vector<8x128xf32>
      %38 = math.exp %37 : vector<8x128xf32>
      %cst_20 = arith.constant 1.000000e+00 : f32
      %39 = vector.broadcast %cst_20 : f32 to vector<8x128xf32>
      %40 = arith.addf %39, %38 : vector<8x128xf32>
      %41 = arith.divf %39, %40 : vector<8x128xf32>
      %42 = arith.mulf %36, %41 : vector<8x128xf32>
      %c0_21 = arith.constant 0 : index
      %c0_22 = arith.constant 0 : index
      %43 = vector.load %arg6[%c0_21, %c0_22] : memref<8x128xf32, #tpu.memory_space<vmem>>, vector<8x128xf32>
      tpu.vector_store %arg6[%c0_21, %c0_22], %42 {strides = array<i32>} : memref<8x128xf32, #tpu.memory_space<vmem>>, vector<8x128xf32>,
    } else {
    }
    return
  }
  func.func @transform_0(%arg0: i32, %arg1: i32) -> (i32, i32) {
    %c0_i32 = arith.constant 0 : i32
    %c0_i32_0 = arith.constant 0 : i32
    %c0_i32_1 = arith.constant 0 : i32
    return %c0_i32, %c0_i32_0 : i32, i32
  }
  func.func @transform_1(%arg0: i32, %arg1: i32) -> (i32, i32) {
    %c0_i32 = arith.constant 0 : i32
    return %arg1, %arg0 : i32, i32
  }
  func.func @transform_2(%arg0: i32, %arg1: i32) -> (i32, i32) {
    %c0_i32 = arith.constant 0 : i32
    %c0_i32_0 = arith.constant 0 : i32
    return %c0_i32, %arg0 : i32, i32
  }
  func.func @transform_3(%arg0: i32, %arg1: i32) -> (i32, i32) {
    %c0_i32 = arith.constant 0 : i32
    %c0_i32_0 = arith.constant 0 : i32
    return %c0_i32, %arg0 : i32, i32
  }
  func.func @transform_4(%arg0: i32, %arg1: i32) -> (i32, i32) {
    %c0_i32 = arith.constant 0 : i32
    %c0_i32_0 = arith.constant 0 : i32
    return %c0_i32, %arg0 : i32, i32
  }
}

</mosaic_0001>

<bundles_post_ra>
// kernel: tpu_custom_call.1
= control target key start
LH: loop header
LB: loop body
LE: loop exit
PB: predicated region body
PF: predicated region fallthrough
CT: control target
= control target key end

     0   :  { %9 = vsyncpa [#allocation4], 0  ;;  %s1149_s0 = inlined_call_operand.hbm [shape: f32[8,128], index: 0, kind: input, shape index: {}]   ;;  %s1150_s1 = inlined_call_operand.hbm [shape: f32[128,256], index: 1, kind: input, shape index: {}]   ;;  %s1151_s2 = inlined_call_operand.vmem [shape: f32[1,256], index: 2, kind: input, shape index: {}]   ;;  %s1152_s3 = inlined_call_operand.vmem [shape: f32[1,256], index: 3, kind: input, shape index: {}]   ;;  %s1153_s4 = inlined_call_operand.hbm [shape: f32[8,256], index: 4, kind: output, shape index: {}]  }
   0x1   :  { %10 = vsyncpa [#allocation7], 0 }
   0x2   :  { %12 = vsyncpa [#allocation7 + $0x1], 0 }
   0x3   :  { %13 = vsyncpa [#allocation5], 0 }
   0x4   :  { %15 = vsyncpa [#allocation5 + $0x1], 0  ;;  %s903_s15 = smov 0   ;;  %s905_s16 = smov 0  }
   0x5   :  { %s907_s17 = smov 0   ;;  %s909_s18 = smov 0  }
   0x6   :  { %s911_s19 = smov 0   ;;  %s913_s20 = smov 0  }
   0x7 LB: > { %s545_s21 = sadd.s32 4294967295, %s867_s20   ;;  %s546_s22 = sadd.s32 4294967294, %s867_s20   ;;  %s867_s20 = sphi %s913_s20, %s21_s20   ;;  %s863_s19 = sphi %s911_s19, %s1181_s19   ;;  %s859_s18 = sphi %s909_s18, %s1180_s18   ;;  %s855_s17 = sphi %s907_s17, %s1179_s17   ;;  %s851_s16 = sphi %s905_s16, %s1178_s16   ;;  %s847_s15 = sphi %s903_s15, %s1177_s15  }
   0x8   : > { %s63_s23 = sadd.s32 1, %s855_s17  ;;  %p70_p0 = scmp.ne.s32.totalorder %s855_s17, %s851_s16 }
   0x9   : > { %p71_p1 = scmp.eq.s32.totalorder %s867_s20, 0  ;;  %p76_p2 = scmp.ne.s32.totalorder %s851_s16, %s847_s15 }
   0xa   : > { %p941_p3 = scmp.eq.s32.totalorder %s545_s21, 0  ;;  %p152_p4 = scmp.eq.s32.totalorder %s545_s21, 1 }
   0xb   : > { %p945_p5 = por %p71_p1, %p70_p0  ;;  %p158_p6 = scmp.eq.s32.totalorder %s546_s22, 1 }
   0xc   : > { %s1160_s24 = scalar_select %p941_p3, 1, 0 }
   0xd   : > { %p951_p7 = por %p941_p3, %p76_p2  ;;  %p955_p8 = por %p152_p4, %p70_p0 }
   0xe   : > { %p959_p9 = por %p158_p6, %p76_p2  ;;  %p547_p10 = scmp.ge.s32.totalorder %s867_s20, 1 }
   0xf   : > { %s1162_s26 = scalar_select %p951_p7, 1, 0 }
  0x10   : > { %s1163_s27 = scalar_select %p955_p8, 1, 0 }
  0x11   : > { %s1164_s28 = scalar_select %p959_p9, 1, 0 }
  0x12   : > { %p165_p11 = scmp.lt.s32.totalorder %s867_s20, 3  ;;  %s869_s30 = smov [#allocation3]  }
  0x13   : > { %s178_s5 = sshll.u32 %s869_s30, 4  ;;  %p659_p1 = scmp.lt.s32.totalorder %s867_s20, 2  ;;  %s179_s5 = int_to_ptr.vmem [resolvable:$true] %s178_s5 }
  0x14   : > { %p966_p13 = pnand %p547_p10, %p165_p11  ;;  %s33_s8 = sadd.s32 1, %s863_s19 }
  0x15   : > { %p975_p4 = pnand %p659_p1, %p945_p5  ;;  %p986_p6 = scmp.ge.s32.totalorder %s33_s8, 2 }
  0x16   : > { %s1165_s29 = scalar_select %p966_p13, 1, 0 }
  0x17   : > { %p646_p0 = pneg %p966_p13  ;;  %s189_s10 = sand.u32 1, %s855_s17  }
  0x18   : > { %s1166_s6 = scalar_select %p975_p4, 1, 0 }
  0x19   : > { %p981_p2 = pnand %p646_p0, %p941_p3  ;;  %s723_s13 = scalar_lea.hbm %s1149_s0, 128 }
  0x1a   : > { %s1168_s9 = scalar_select %p986_p6, 1, 0 }
  0x1b   : > { %p724_p5 = scmp.ne.s32.totalorder %s1149_s0, %s723_s13  ;;  %p725_p10 = pneg %p981_p2 }
  0x1c   : > { %p730_p0 = scmp.lt.u32.totalorder %s723_s13, %s1149_s0 }
  0x1d   : > { %p726_p11 = pnand %p725_p10, %p724_p5 }
  0x1f   : > { %p727_p1 = pneg %p726_p11 }
  0x21   : > { %p732_p12 = pnand %p730_p0, %p727_p1 }
  0x23   : > { %735 = shalt.err (!%p732_p12)
}
  0x24   : > { %s736_s30 = scalar_lea.vmem %s179_s5, 128  ;;  %p744_p3 = scmp.lt.s32.totalorder %s179_s5, %s179_s5 }
  0x25   : > { %p737_p9 = scmp.ne.s32.totalorder %s179_s5, %s736_s30  ;;  %p745_p13 = scmp.lt.s32.totalorder %s736_s30, %s736_s30 }
  0x27   : > { %p739_p8 = pnand %p737_p9, %p725_p10  ;;  %p746_p4 = por %p745_p13, %p744_p3 }
  0x29   : > { %p740_p7 = pneg %p739_p8 }
  0x2b   : > { %p747_p6 = pnand %p746_p4, %p740_p7 }
  0x2d   : > { %750 = shalt.err (!%p747_p6)
}
  0x2e   : > { %649 = dma.hbm_to_vmem [thread:$0]  (!%p981_p2), %s1149_s0, 128, %s179_s5, [#allocation4]  }
  0x2f   : > { %p1169_p9 = scmp.ne.s32.totalorder %s1168_s9, 0  ;;  %s550_s13 = sshll.u32 %s189_s10, 7 }
  0x30   : > { %s551_s21 = sshll.u32 %s863_s19, 7  ;;  %s193_s30 = scalar_lea.vmem [#allocation6], %s550_s13 }
  0x31   : > { %s1183_s8 = smov (%p1169_p9, %s33_s8), 0  ;;  %s1017_s25 = scalar_lea.hbm %s1150_s1, %s551_s21 }
  0x32   : > { %s59_s14 = ssub.s32 %s863_s19, %s1183_s8  ;;  %s202_s11 = sshll.u32 %s193_s30, 4  ;;  %s1024_s11 = int_to_ptr.vmem [resolvable:$true] %s202_s11 }
  0x33   : > { %p61_p3 = scmp.eq.s32.totalorder %s59_s14, 0  ;;  %s1026_s9 = scalar_lea.sflag [#allocation7], %s189_s10 }
  0x34   : > { %s751_s12 = scalar_lea.hbm %s1017_s25, 2048  ;;  %p1170_p8 = scmp.ne.s32.totalorder %s1166_s6, 0 }
  0x35   : > { %s1022_s5 = scalar_select %p61_p3, %s855_s17, %s63_s23  }
  0x36   : > { %p752_p7 = scmp.ne.s32.totalorder %s1017_s25, %s751_s12  ;;  %p753_p12 = pneg %p1170_p8 }
  0x37   : > { %s756_s13 = scalar_lea.hbm %s1150_s1, 4096  ;;  %p757_p2 = scmp.lt.u32.totalorder %s1017_s25, %s1150_s1 }
  0x38   : > { %p754_p13 = pnand %p753_p12, %p752_p7  ;;  %p758_p6 = scmp.lt.u32.totalorder %s756_s13, %s751_s12 }
  0x39   : > { %p760_p10 = scmp.lt.u32.totalorder %s751_s12, %s1017_s25 }
  0x3a   : > { %p755_p4 = pneg %p754_p13  ;;  %p759_p5 = por %p758_p6, %p757_p2 }
  0x3c   : > { %p761_p11 = por %p760_p10, %p759_p5 }
  0x3e   : > { %p762_p1 = pnand %p761_p11, %p755_p4 }
  0x40   : > { %765 = shalt.err (!%p762_p1)
}
  0x41   : > { %s766_s23 = scalar_lea.vmem %s1024_s11, 2048  ;;  %s870_s10 = smov [#allocation6]  }
  0x42   : > { %p767_p0 = scmp.ne.s32.totalorder %s1024_s11, %s766_s23  ;;  %s771_s30 = sshll.u32 %s870_s10, 4  ;;  %s772_s30 = int_to_ptr.vmem [resolvable:$false] %s771_s30 }
  0x43   : > { %s773_s14 = scalar_lea.vmem %s772_s30, 4096  ;;  %p774_p7 = scmp.lt.s32.totalorder %s1024_s11, %s772_s30 }
  0x44   : > { %p769_p9 = pnand %p767_p0, %p753_p12  ;;  %p775_p13 = scmp.lt.s32.totalorder %s773_s14, %s766_s23 }
  0x46   : > { %p770_p3 = pneg %p769_p9  ;;  %p776_p2 = por %p775_p13, %p774_p7 }
  0x48   : > { %p777_p6 = pnand %p776_p2, %p770_p3 }
  0x4a   : > { %780 = shalt.err (!%p777_p6)
}
  0x4b   : > { %s871_s12 = smov 256   ;;  %s872_s21 = smov 128  }
  0x4c   : > { %s873_s13 = smov 8   ;;  %p1171_p12 = scmp.ne.s32.totalorder %s1165_s29, 0 }
  0x4d   : > { %653 = dma.hbm_to_vmem [thread:$0]  (!%p1170_p8), %s1017_s25, 2048, %s1024_s11, %s1026_s9, %s871_s12, %s872_s21, %s873_s13  }
  0x4e   : > { %226 = sbr.rel (%p1171_p12) target bundleno = 431 (0x1af), region = 36  ;;  %p1172_p4 = scmp.ne.s32.totalorder (!%p1171_p12), %s1160_s24, 0 }
  0x55   : > { %834 = dma.done.wait (%p1172_p4), [#allocation4], 128  }
  0x56   : > { %836 = vsyncadd (%p1172_p4), [#allocation4], 4294967168  ;;  %s1061_s7 = sand.u32 1, %s851_s16   ;;  %p1173_p8 = scmp.ne.s32.totalorder %s1162_s26, 0 }
  0x57   : > { %s554_s22 = sshll.u32 %s1061_s7, 7  ;;  %s233_s23 = scalar_lea.sflag [#allocation7], %s1061_s7 }
  0x58   : > { %s1065_s10 = scalar_lea.vmem [#allocation6], %s554_s22 }
  0x59   : > { %838 = dma.done.wait (%p1173_p8), %s233_s23, 2048  }
  0x5a   : > { %840 = vsyncadd (%p1173_p8), %s233_s23, 4294965248  ;;  %v874_v0 = vmov 0.0|0.0   ;;  %vm875_vm0 = vmmov 0   ;;  %v876_v1 = vmov 0.0   ;;  %v285_v2 = vld [vmem:[%s1065_s10] sm:$0xff]  ;;  %v286_v3 = vld [vmem:[%s1065_s10 + $0x8] sm:$0xff]  ;;  %v398_v46 = vlaneseq }
  0x5b   : > { %614 = vmatprep.subr.bf16.mxu0 %v874_v0  ;;  %611 = vmatprep.mubr.msk.f32.mxu0 %vm875_vm0, %v876_v1  ;;  %v287_v4 = vld [vmem:[%s1065_s10 + $0x10] sm:$0xff]  ;;  %v615_v5 = vpack.c.bf16 %v286_v3, %v285_v2  ;;  %v288_v6 = vld [vmem:[%s1065_s10 + $0x18] sm:$0xff]  ;;  %v289_v8 = vld [vmem:[%s1065_s10 + $0x20] sm:$0xff]  ;;  %p268_p5 = scmp.lt.s32.totalorder %s859_s18, 1  ;;  %s555_s30 = sshll.u32 %s1061_s7, 3 }
  0x5c   : > { %v618_v7 = vpack.c.bf16 %v288_v6, %v287_v4  ;;  %v290_v9 = vld [vmem:[%s1065_s10 + $0x28] sm:$0xff]  ;;  %v291_v11 = vld [vmem:[%s1065_s10 + $0x30] sm:$0xff]  ;;  %v292_v12 = vld [vmem:[%s1065_s10 + $0x38] sm:$0xff]  ;;  %v399_v47 = vshrl.u32 %v398_v46, 7  ;;  %s559_s14 = sshll.u32 %s859_s18, 7  ;;  %s266_s12 = scalar_lea.vmem [#allocation8], %s555_s30 }
  0x5d   : > { %616 = vmatpush3.bf16.msra.mxu0 %v615_v5  ;;  %v621_v10 = vpack.c.bf16 %v290_v9, %v289_v8  ;;  %v624_v13 = vpack.c.bf16 %v292_v12, %v291_v11  ;;  %v293_v14 = vld [vmem:[%s1065_s10 + $0x40] sm:$0xff]  ;;  %v294_v15 = vld [vmem:[%s1065_s10 + $0x48] sm:$0xff]  ;;  %v295_v17 = vld [vmem:[%s1065_s10 + $0x50] sm:$0xff]  ;;  %s269_s24 = scalar_select %p268_p5, %s859_s18, 1 }
  0x5e   : > { %617 = vmatprep.subr.bf16.mxu0 %v874_v0  ;;  %v627_v16 = vpack.c.bf16 %v294_v15, %v293_v14  ;;  %v296_v18 = vld [vmem:[%s1065_s10 + $0x58] sm:$0xff]  ;;  %v297_v20 = vld [vmem:[%s1065_s10 + $0x60] sm:$0xff]  ;;  %v298_v21 = vld [vmem:[%s1065_s10 + $0x68] sm:$0xff]  ;;  %v400_v49 = vsub.s32 0, %v399_v47  ;;  %s434_s21 = sshll.u32 %s266_s12, 4  ;;  %s1100_s23 = scalar_lea.hbm %s1153_s4, %s559_s14  ;;  %s1102_s21 = int_to_ptr.vmem [resolvable:$true] %s434_s21 }
  0x5f   : > { %v630_v19 = vpack.c.bf16 %v296_v18, %v295_v17  ;;  %v633_v22 = vpack.c.bf16 %v298_v21, %v297_v20  ;;  %v299_v23 = vld [vmem:[%s1065_s10 + $0x70] sm:$0xff]  ;;  %v300_v24 = vld [vmem:[%s1065_s10 + $0x78] sm:$0xff]  ;;  %s270_s6 = scalar_lea.vmem %s1151_s2, %s269_s24  ;;  %s273_s9 = scalar_lea.vmem %s1152_s3, %s269_s24 }
  0x60   : > { %v636_v25 = vpack.c.bf16 %v300_v24, %v299_v23  ;;  %v283_v26 = vld [vmem:[#allocation3] sm:$0xff]  ;;  %s421_s10 = scalar_lea.sflag [#allocation5], %s1061_s7  ;;  %s781_s24 = scalar_lea.vmem %s1102_s21, 128 }
  0x61   : > { %619 = vmatpush3.bf16.msra.mxu0 %v618_v7  ;;  %v393_v48 = vld [vmem:[%s270_s6] sm:$0x1]  ;;  %p782_p10 = scmp.ne.s32.totalorder %s1102_s21, %s781_s24  ;;  %p1174_p11 = scmp.ne.s32.totalorder %s1163_s27, 0 }
  0x62   : > { %620 = vmatprep.subr.bf16.mxu0 %v874_v0  ;;  %v556_v53 = vld [vmem:[%s273_s9] ss:$0 sm:$0xff]  ;;  %s877_s18 = smov [#allocation8]  }
  0x63   : > { %p783_p1 = pnand %p782_p10, %p1174_p11  ;;  %s785_s26 = sshll.u32 %s877_s18, 4  ;;  %s786_s26 = int_to_ptr.vmem [resolvable:$false] %s785_s26 }
  0x64   : > { %s787_s29 = scalar_lea.vmem %s786_s26, 256  ;;  %p788_p9 = scmp.lt.s32.totalorder %s1102_s21, %s786_s26 }
  0x65   : > { %622 = vmatpush3.bf16.msra.mxu0 %v621_v10  ;;  %p784_p0 = pneg %p783_p1  ;;  %p789_p3 = scmp.lt.s32.totalorder %s787_s29, %s781_s24 }
  0x66   : > { %623 = vmatprep.subr.bf16.mxu0 %v874_v0 }
  0x67   : > { %p790_p7 = por %p789_p3, %p788_p9 }
  0x69   : > { %625 = vmatpush3.bf16.msra.mxu0 %v624_v13  ;;  %p791_p13 = pnand %p790_p7, %p784_p0 }
  0x6a   : > { %626 = vmatprep.subr.bf16.mxu0 %v874_v0 }
  0x6d   : > { %628 = vmatpush3.bf16.msra.mxu0 %v627_v16 }
  0x6e   : > { %629 = vmatprep.subr.bf16.mxu0 %v874_v0 }
  0x71   : > { %631 = vmatpush3.bf16.msra.mxu0 %v630_v19 }
  0x72   : > { %632 = vmatprep.subr.bf16.mxu0 %v874_v0 }
  0x75   : > { %634 = vmatpush3.bf16.msra.mxu0 %v633_v22 }
  0x76   : > { %635 = vmatprep.subr.bf16.mxu0 %v874_v0 }
  0x79   : > { %637 = vmatpush3.bf16.msra.mxu0 %v636_v25 }
  0x7c   : > { %612 = vmatmul.mubr.f32.vlgmr.msra.gmra.mrb[0].mxu0 %v283_v26 }
 0x14f   : > { %v367_v27 = vpop.f32.mrb[0].mxu0 }
 0x150   : > { %v377_v28 = vrot.slane %v367_v27, 4  ;;  %v613_v29 = vpop.f32.mrb[1].mxu0 }
 0x152   : > { %v378_v30 = vadd.f32 %v377_v28, %v367_v27 }
 0x154   : > { %v379_v31 = vrot.slane %v378_v30, 2 }
 0x156   : > { %v380_v32 = vadd.f32 %v379_v31, %v378_v30 }
 0x158   : > { %v381_v33 = vrot.slane %v380_v32, 1 }
 0x15a   : > { %v382_v34 = vadd.f32 %v381_v33, %v380_v32 }
 0x15c   : > { %v383_v35 = vmul.f32 0.125, %v382_v34 }
 0x15e   : > { %v384_v36 = vsub.f32 %v367_v27, %v383_v35 }
 0x160   : > { %v385_v37 = vmul.f32 %v384_v36, %v384_v36 }
 0x162   : > { %v386_v38 = vrot.slane %v385_v37, 4 }
 0x164   : > { %v387_v39 = vadd.f32 %v386_v38, %v385_v37 }
 0x166   : > { %v388_v40 = vrot.slane %v387_v39, 2 }
 0x168   : > { %v389_v41 = vadd.f32 %v388_v40, %v387_v39 }
 0x16a   : > { %v390_v42 = vrot.slane %v389_v41, 1 }
 0x16c   : > { %v391_v43 = vadd.f32 %v390_v42, %v389_v41 }
 0x16e   : > { %v392_v44 = vmul.f32 0.125, %v391_v43 }
 0x170   : > { %v394_v45 = vadd.f32 1e-05, %v392_v44 }
 0x172   : > { %717 = vrsqrt.f32 %v394_v45 }
 0x17c   : > { %v718_v50 = vpop.eup %717 }
 0x17d   : > { %v396_v51 = vmul.f32 %v718_v50, %v393_v48 }
 0x17f   : > { %v401_v52 = vrot.slane %v396_v51, %v400_v49 }
 0x181   : > { %v403_v54 = vmul.f32 %v401_v52, %v384_v36 }
 0x183   : > { %v411_v55 = vadd.f32 %v556_v53, %v403_v54 }
 0x185   : > { %v557_v56 = vmul.f32 -1.442695, %v411_v55 }
 0x187   : > { %719 = vpow2.f32 %v557_v56 }
 0x191   : > { %v720_v57 = vpop.eup %719 }
 0x192   : > { %v415_v58 = vadd.f32 1.0, %v720_v57 }
 0x194   : > { %721 = vrcp.f32 %v415_v58 }
 0x19e   : > { %v722_v59 = vpop.eup %721 }
 0x19f   : > { %v418_v60 = vmul.f32 %v722_v59, %v411_v55 }
 0x1a1   : > { %419 = vst [vmem:[%s266_s12] sm:$0xff] %v418_v60 }
 0x1a2   : > { %794 = shalt.err (!%p791_p13)
}
 0x1a3   : > { %s795_s7 = scalar_lea.hbm %s1100_s23, 128  ;;  %s799_s11 = scalar_lea.hbm %s1153_s4, 256 }
 0x1a4   : > { %p796_p2 = scmp.ne.s32.totalorder %s1100_s23, %s795_s7  ;;  %p800_p4 = scmp.lt.u32.totalorder %s1100_s23, %s1153_s4 }
 0x1a5   : > { %p801_p8 = scmp.lt.u32.totalorder %s799_s11, %s795_s7  ;;  %p803_p10 = scmp.lt.u32.totalorder %s795_s7, %s1100_s23 }
 0x1a6   : > { %p797_p6 = pnand %p796_p2, %p1174_p11 }
 0x1a7   : > { %p802_p5 = por %p801_p8, %p800_p4 }
 0x1a8   : > { %p798_p12 = pneg %p797_p6 }
 0x1a9   : > { %p804_p1 = por %p803_p10, %p802_p5 }
 0x1ab   : > { %p805_p0 = pnand %p804_p1, %p798_p12 }
 0x1ad   : > { %808 = shalt.err (!%p805_p0)
}
 0x1ae   : > { %644 = dma.vmem_to_hbm [thread:$0]  (%p1174_p11), %s1102_s21, 128, %s1100_s23, %s421_s10  }
 0x1af PF: > { %s446_s14 = sand.u32 1, %s847_s15   ;;  %p1175_p9 = scmp.ne.s32.totalorder %s1164_s28, 0 }
 0x1b0   : > { %p1176_p3 = scmp.ge.s32.totalorder %s867_s20, 2  ;;  %s447_s12 = scalar_lea.sflag [#allocation5], %s446_s14 }
 0x1b2   : > { %p655_p7 = pnand %p1176_p3, %p1175_p9 }
 0x1b4   : > { %842 = dma.done.wait (!%p655_p7), %s447_s12, 128  }
 0x1b5   : > { %844 = vsyncadd (!%p655_p7), %s447_s12, 4294967168  ;;  %s21_s20 = sadd.s32 1, %s867_s20   ;;  %s1177_s15 = smov %s851_s16 }
 0x1b6   : > { %p18_p13 = scmp.ge.s32.totalorder %s21_s20, 4   ;;  %s1178_s16 = smov %s855_s17 }
 0x1b7   : > { %s1179_s17 = smov %s1022_s5  ;;  %s1180_s18 = smov %s863_s19 }
 0x1b8   : > { %s1181_s19 = smov %s1183_s8  ;;  %20 = sbr.rel (!%p18_p13) target bundleno = 7 (0x7), region = 101 }
 0x1bf   :  { %452 = vsyncpa [#allocation4], 1 }
 0x1c0   :  { %454 = vsyncpa [#allocation4 + $0x1], 1 }
 0x1c1   :  { %455 = vsyncpa [#allocation7], 1 }
 0x1c2   :  { %457 = vsyncpa [#allocation7 + $0x1], 1 }
 0x1c3   :  { %458 = vsyncpa [#allocation5], 1 }
 0x1c4   :  { %460 = vsyncpa [#allocation5 + $0x1], 1 }

</bundles_post_ra>
